<compile_context>
chip_gen: v6e
topology: v6e:2x2x1
jax: 0.10.0
libtpu: 0.0.40
codegen_flags: <defaults>
</compile_context>

<pallas_src>
import functools
import math

import jax
import jax.numpy as jnp
from jax.experimental import pallas as pl
from jax.experimental.pallas import tpu as pltpu


_VMEM_LIMIT = 32 * 1024 * 1024  # explicit; well under v7x's 64 MiB physical VMEM


# ----------------------------- Pallas kernels ------------------------------ #

def _lrn_across_kernel(x_ref, m_ref, o_ref, *, beta):
    # x_ref: (1, C, T) tile; m_ref: (C, C) banded window matrix with alpha/L folded in.
    x = x_ref[0].astype(jnp.float32)                                    # (C, T)
    sq = x * x
    a = jnp.dot(m_ref[...], sq, preferred_element_type=jnp.float32)    # alpha * windowed avg
    # (1 + alpha*avg)^(-beta) via exp(-beta*log(.)) : fuses the divide into the exponent.
    scale = jnp.exp(-beta * jnp.log(a + 1.0))
    o_ref[...] = (x * scale)[None].astype(o_ref.dtype)


def _lrn_within_kernel(x_ref, mh_ref, mwt_ref, o_ref, *, beta, gc):
    # x_ref/o_ref: (1, Gc, H, W); mh_ref: (H, H) with alpha/L^2 folded in;
    # mwt_ref: (W, W) transposed band matrix. Static unroll over the small channel group.
    for c in range(gc):
        xc = x_ref[0, c].astype(jnp.float32)                            # (H, W)
        sq = xc * xc
        t = jnp.dot(sq, mwt_ref[...], preferred_element_type=jnp.float32)   # W-direction avg
        a = jnp.dot(mh_ref[...], t, preferred_element_type=jnp.float32)     # H-direction avg (*alpha)
        o_ref[0, c] = (xc * jnp.exp(-beta * jnp.log(a + 1.0))).astype(o_ref.dtype)


# ------------------------------ host helpers ------------------------------- #

def _band_matrix(n, local_size):
    """M[out, in] = 1 if `in` lies in the size-`local_size` window centered
    (PyTorch-style, pad=(L-1)//2, count_include_pad) at `out`, else 0."""
    pad = (local_size - 1) // 2
    idx = jnp.arange(n)
    diff = idx[None, :] - idx[:, None]               # in - out
    mask = (diff >= -pad) & (diff <= local_size - 1 - pad)
    return mask.astype(jnp.float32)


def _pick_lane_tile(hw, target=1024):
    # Full-extent lane block when small; otherwise a 128-multiple tile so each grid
    # step stays in the measured 512-1024-lane sweet spot (partial last block is fine:
    # the compute is lane-local and OOB writes are dropped).
    if hw <= 2 * target:
        return hw
    return target


def _pick_channel_group(C, H, W, target_bytes=512 * 1024, cap=16):
    # Channels per grid step on the within-channel path: a divisor of C (exact blocks),
    # capped so both the static unroll and the (Gc, H, W) block stay small.
    budget = max(1, target_bytes // max(1, H * W * 4))
    limit = max(1, min(C, cap, budget))
    best = 1
    for g in range(1, limit + 1):
        if C % g == 0:
            best = g
    return best


def lrn_pallas(x, *, local_size=1, alpha=1.0, beta=0.75, across_channels=True):
    """Exact forward of the PyTorch LRN module (count_include_pad average pooling)."""
    N, C, H, W = x.shape
    dtype = x.dtype
    L = int(local_size)
    alpha = float(alpha)
    beta = float(beta)

    if across_channels:
        # AvgPool3d((L,1,1), stride=1, pad=((L-1)//2,0,0)) over x^2, divisor = L.
        hw = H * W
        T = _pick_lane_tile(hw)
        m = _band_matrix(C, L) * (alpha / L)                  # alpha and 1/L folded in
        x2 = x.reshape(N, C, hw)
        out = pl.pallas_call(
            functools.partial(_lrn_across_kernel, beta=beta),
            out_shape=jax.ShapeDtypeStruct((N, C, hw), dtype),
            grid_spec=pltpu.PrefetchScalarGridSpec(
                num_scalar_prefetch=0,
                grid=(N, pl.cdiv(hw, T)),
                in_specs=[
                    pl.BlockSpec((1, C, T), lambda n, s: (n, 0, s)),
                    pl.BlockSpec((C, C), lambda n, s: (0, 0)),
                ],
                out_specs=pl.BlockSpec((1, C, T), lambda n, s: (n, 0, s)),
            ),
            compiler_params=pltpu.CompilerParams(
                dimension_semantics=("parallel", "parallel"),
                vmem_limit_bytes=_VMEM_LIMIT,
            ),
        )(x2, m)
        return out.reshape(N, C, H, W)

    # AvgPool2d(L, stride=1, pad=(L-1)//2) over x^2, divisor = L*L (separable window).
    Gc = _pick_channel_group(C, H, W)
    mh = _band_matrix(H, L) * (alpha / (L * L))               # alpha and 1/L^2 folded in
    mwt = _band_matrix(W, L).T
    out = pl.pallas_call(
        functools.partial(_lrn_within_kernel, beta=beta, gc=Gc),
        out_shape=jax.ShapeDtypeStruct((N, C, H, W), dtype),
        grid_spec=pltpu.PrefetchScalarGridSpec(
            num_scalar_prefetch=0,
            grid=(N, C // Gc),
            in_specs=[
                pl.BlockSpec((1, Gc, H, W), lambda n, c: (n, c, 0, 0)),
                pl.BlockSpec((H, H), lambda n, c: (0, 0)),
                pl.BlockSpec((W, W), lambda n, c: (0, 0)),
            ],
            out_specs=pl.BlockSpec((1, Gc, H, W), lambda n, c: (n, c, 0, 0)),
        ),
        compiler_params=pltpu.CompilerParams(
            dimension_semantics=("parallel", "parallel"),
            vmem_limit_bytes=_VMEM_LIMIT,
        ),
    )(x, mh, mwt)
    return out


# ------------------------------ JAX reference ------------------------------ #

def lrn_ref(x, *, local_size=1, alpha=1.0, beta=0.75, across_channels=True):
    pad = (local_size - 1) // 2
    N, C, H, W = x.shape
    sq = x * x
    if across_channels:
        padded = jnp.pad(sq, ((0, 0), (pad, local_size - 1 - pad), (0, 0), (0, 0)))
        acc = sum(padded[:, d:d + C] for d in range(local_size)) / local_size
    else:
        padded = jnp.pad(sq, ((0, 0), (0, 0),
                              (pad, local_size - 1 - pad),
                              (pad, local_size - 1 - pad)))
        acc = sum(padded[:, :, i:i + H, j:j + W]
                  for i in range(local_size)
                  for j in range(local_size)) / (local_size * local_size)
    div = (acc * alpha + 1.0) ** beta
    return x / div


# ----------------------------------- main ----------------------------------- #

if __name__ == "__main__":
    key = jax.random.PRNGKey(0)
    x = jax.random.normal(key, (2, 4, 16, 16), dtype=jnp.float32)

    # Default module config: LRN(local_size=1, alpha=1.0, beta=0.75, ACROSS_CHANNELS=True)
    y0 = jax.block_until_ready(lrn_pallas(x, local_size=1, alpha=1.0, beta=0.75,
                                          across_channels=True))
    r0 = lrn_ref(x, local_size=1, alpha=1.0, beta=0.75, across_channels=True)
    assert jnp.allclose(y0, r0, rtol=1e-5, atol=1e-5)

    # Cross-channel LRN with a real window (AlexNet-style usage).
    y1 = jax.block_until_ready(lrn_pallas(x, local_size=3, alpha=1.0, beta=0.75,
                                          across_channels=True))
    r1 = lrn_ref(x, local_size=3, alpha=1.0, beta=0.75, across_channels=True)
    assert jnp.allclose(y1, r1, rtol=1e-5, atol=1e-5)

    # Within-channel (ACROSS_CHANNELS=False) path.
    y2 = jax.block_until_ready(lrn_pallas(x, local_size=3, alpha=1.0, beta=0.75,
                                          across_channels=False))
    r2 = lrn_ref(x, local_size=3, alpha=1.0, beta=0.75, across_channels=False)
    assert jnp.allclose(y2, r2, rtol=1e-5, atol=1e-5)

    print("KERNEL_OK")
</pallas_src>

<mosaic_0001>
module attributes {stable_mosaic.version = 11 : i64} {
  func.func @_lrn_across_kernel(%arg0: i32, %arg1: i32, %arg2: memref<1x4x256xf32, #tpu.memory_space<vmem>>, %arg3: memref<4x4xf32, #tpu.memory_space<vmem>>, %arg4: memref<1x4x256xf32, #tpu.memory_space<vmem>>) attributes {dimension_semantics = [#tpu.dimension_semantics<parallel>, #tpu.dimension_semantics<parallel>], iteration_bounds = array<i64: 2, 1>, scalar_prefetch = 0 : i64, scratch_operands = 0 : i64, tpu.core_type = #tpu.core_type<tc>, window_params = [{transform_indices = @transform_0, window_bounds = array<i64: 1, 4, 256>}, {pipeline_mode = #tpu.pipeline_mode<synchronous>, transform_indices = @transform_1, window_bounds = array<i64: 4, 4>}, {transform_indices = @transform_2, window_bounds = array<i64: 1, 4, 256>}]} {
    %c0 = arith.constant 0 : index
    %c0_0 = arith.constant 0 : index
    %c0_1 = arith.constant 0 : index
    %0 = vector.load %arg2[%c0, %c0_0, %c0_1] : memref<1x4x256xf32, #tpu.memory_space<vmem>>, vector<1x4x256xf32>
    %1 = vector.shape_cast %0 : vector<1x4x256xf32> to vector<4x256xf32>
    %2 = arith.mulf %1, %1 : vector<4x256xf32>
    %c0_2 = arith.constant 0 : index
    %c0_3 = arith.constant 0 : index
    %3 = vector.load %arg3[%c0_2, %c0_3] : memref<4x4xf32, #tpu.memory_space<vmem>>, vector<4x4xf32>
    %cst = arith.constant dense<0.000000e+00> : vector<4x256xf32>
    %4 = tpu.matmul %3, %2, %cst {dimension_numbers = #tpu.dot_dimension_numbers<[1], [0], [0], [1], [0, 0, 1, 1], [], []>} : vector<4x4xf32>, vector<4x256xf32>, vector<4x256xf32> -> vector<4x256xf32>
    %cst_4 = arith.constant 1.000000e+00 : f32
    %5 = vector.broadcast %cst_4 : f32 to vector<4x256xf32>
    %6 = arith.addf %4, %5 : vector<4x256xf32>
    %7 = math.log %6 : vector<4x256xf32>
    %cst_5 = arith.constant -7.500000e-01 : f32
    %8 = vector.broadcast %cst_5 : f32 to vector<4x256xf32>
    %9 = arith.mulf %8, %7 : vector<4x256xf32>
    %10 = math.exp %9 : vector<4x256xf32>
    %11 = arith.mulf %1, %10 : vector<4x256xf32>
    %12 = vector.shape_cast %11 : vector<4x256xf32> to vector<1x4x256xf32>
    %c0_6 = arith.constant 0 : index
    %c0_7 = arith.constant 0 : index
    %c0_8 = arith.constant 0 : index
    %13 = vector.load %arg4[%c0_6, %c0_7, %c0_8] : memref<1x4x256xf32, #tpu.memory_space<vmem>>, vector<1x4x256xf32>
    tpu.vector_store %arg4[%c0_6, %c0_7, %c0_8], %12 {strides = array<i32>} : memref<1x4x256xf32, #tpu.memory_space<vmem>>, vector<1x4x256xf32>,
    return
  }
  func.func @transform_0(%arg0: i32, %arg1: i32) -> (i32, i32, i32) {
    %c0_i32 = arith.constant 0 : i32
    %c0_i32_0 = arith.constant 0 : i32
    return %arg0, %c0_i32, %arg1 : i32, i32, i32
  }
  func.func @transform_1(%arg0: i32, %arg1: i32) -> (i32, i32) {
    %c0_i32 = arith.constant 0 : i32
    %c0_i32_0 = arith.constant 0 : i32
    %c0_i32_1 = arith.constant 0 : i32
    return %c0_i32, %c0_i32_0 : i32, i32
  }
  func.func @transform_2(%arg0: i32, %arg1: i32) -> (i32, i32, i32) {
    %c0_i32 = arith.constant 0 : i32
    %c0_i32_0 = arith.constant 0 : i32
    return %arg0, %c0_i32, %arg1 : i32, i32, i32
  }
}

</mosaic_0001>

<bundles_post_ra>
// kernel: tpu_custom_call.1
= control target key start
LH: loop header
LB: loop body
LE: loop exit
PB: predicated region body
PF: predicated region fallthrough
CT: control target
= control target key end

     0   :  { %7 = vsyncpa [#allocation3], 0  ;;  %s833_s0 = inlined_call_operand.hbm [shape: f32[2,4,256], index: 0, kind: input, shape index: {}]   ;;  %s834_s1 = inlined_call_operand.hbm [shape: f32[4,4], index: 1, kind: input, shape index: {}]   ;;  %s835_s2 = inlined_call_operand.hbm [shape: f32[2,4,256], index: 2, kind: output, shape index: {}]  }
   0x1   :  { %9 = vsyncpa [#allocation3 + $0x1], 0 }
   0x2   :  { %10 = vsyncpa [#allocation6], 0 }
   0x3   :  { %11 = vsyncpa [#allocation4], 0 }
   0x4   :  { %13 = vsyncpa [#allocation4 + $0x1], 0  ;;  %s668_s9 = smov 0   ;;  %s670_s10 = smov 0  }
   0x5   :  { %s672_s11 = smov 0   ;;  %s674_s12 = smov 0  }
   0x6   :  { %s676_s13 = smov 0   ;;  %s678_s14 = smov 0  }
   0x7 LB: > { %s405_s15 = sadd.s32 4294967295, %s647_s14   ;;  %s406_s16 = sadd.s32 4294967294, %s647_s14   ;;  %s647_s14 = sphi %s678_s14, %s19_s14   ;;  %s643_s13 = sphi %s676_s13, %s852_s13   ;;  %s639_s12 = sphi %s674_s12, %s851_s12   ;;  %s635_s11 = sphi %s672_s11, %s850_s11   ;;  %s631_s10 = sphi %s670_s10, %s849_s10   ;;  %s627_s9 = sphi %s668_s9, %s848_s9  }
   0x8   : > { %p53_p0 = scmp.ne.s32.totalorder %s631_s10, %s627_s9  ;;  %p702_p1 = scmp.eq.s32.totalorder %s405_s15, 0 }
   0x9   : > { %p706_p2 = scmp.eq.s32.totalorder %s405_s15, 1  ;;  %p106_p3 = scmp.eq.s32.totalorder %s406_s16, 1 }
   0xa   : > { %p712_p4 = por %p702_p1, %p53_p0  ;;  %p407_p5 = scmp.ge.s32.totalorder %s647_s14, 1 }
   0xb   : > { %p717_p6 = por %p106_p3, %p53_p0  ;;  %p113_p7 = scmp.lt.s32.totalorder %s647_s14, 3 }
   0xc   : > { %s839_s19 = scalar_select %p712_p4, 1, 0 }
   0xd   : > { %s840_s20 = scalar_select %p717_p6, 1, 0 }
   0xe   : > { %p722_p8 = pnand %p407_p5, %p113_p7  ;;  %s649_s22 = smov [#allocation5]  }
   0xf   : > { %s126_s23 = sshll.u32 %s649_s22, 4  ;;  %s31_s25 = sadd.s32 1, %s643_s13  ;;  %s127_s23 = int_to_ptr.vmem [resolvable:$true] %s126_s23 }
  0x10   : > { %p435_p10 = pneg %p722_p8  ;;  %s40_s26 = sadd.s32 1, %s635_s11 }
  0x11   : > { %p33_p12 = scmp.ge.s32.totalorder %s31_s25, 2  ;;  %s520_s27 = scalar_lea.vmem %s127_s23, 64 }
  0x12   : > { %p731_p11 = pnand %p435_p10, %p702_p1  ;;  %p521_p0 = scmp.ne.s32.totalorder %s127_s23, %s520_s27 }
  0x13   : > { %p528_p7 = scmp.lt.s32.totalorder %s127_s23, %s127_s23  ;;  %p529_p6 = scmp.lt.s32.totalorder %s520_s27, %s520_s27 }
  0x14   : > { %p511_p13 = pneg %p731_p11 }
  0x15   : > { %p530_p9 = por %p529_p6, %p528_p7 }
  0x16   : > { %p523_p3 = pnand %p521_p0, %p511_p13 }
  0x18   : > { %p524_p5 = pneg %p523_p3 }
  0x1a   : > { %p531_p4 = pnand %p530_p9, %p524_p5 }
  0x1c   : > { %534 = shalt.err (!%p531_p4)
}
  0x1d   : > { %438 = dma.hbm_to_vmem [thread:$0]  (!%p731_p11), %s834_s1, 64, %s127_s23, [#allocation6]  }
  0x1e   : > { %s854_s25 = smov (%p33_p12, %s31_s25), 0  ;;  %p47_p6 = scmp.ne.s32.totalorder %s635_s11, %s631_s10 }
  0x1f   : > { %p48_p4 = scmp.eq.s32.totalorder %s647_s14, 0  ;;  %s35_s30 = ssub.s32 %s643_s13, %s854_s25 }
  0x20   : > { %p448_p9 = scmp.lt.s32.totalorder %s647_s14, 2  ;;  %p38_p10 = scmp.eq.s32.totalorder %s35_s30, 0 }
  0x21   : > { %p49_p13 = por %p48_p4, %p47_p6  ;;  %p754_p0 = por %p706_p2, %p47_p6 }
  0x22   : > { %s137_s4 = sand.u32 1, %s635_s11   ;;  %s425_s7 = sshll.u32 %s643_s13, 7 }
  0x23   : > { %s760_s5 = scalar_select %p38_p10, %s635_s11, %s40_s26  }
  0x24   : > { %s410_s6 = sshll.u32 %s137_s4, 3  ;;  %s149_s16 = scalar_lea.hbm %s833_s0, %s425_s7 }
  0x25   : > { %s141_s22 = scalar_lea.vmem [#allocation2], %s410_s6  ;;  %p766_p11 = pnand %p448_p9, %p49_p13 }
  0x26   : > { %s151_s23 = sshll.u32 %s141_s22, 4  ;;  %s138_s18 = scalar_lea.sflag [#allocation3], %s137_s4  ;;  %s152_s23 = int_to_ptr.vmem [resolvable:$true] %s151_s23 }
  0x27   : > { %p537_p2 = pneg %p766_p11  ;;  %s548_s27 = scalar_lea.vmem %s152_s23, 128 }
  0x28   : > { %p549_p12 = scmp.ne.s32.totalorder %s152_s23, %s548_s27  ;;  %s650_s26 = smov [#allocation2]  }
  0x29   : > { %s553_s28 = sshll.u32 %s650_s26, 4  ;;  %s554_s28 = int_to_ptr.vmem [resolvable:$false] %s553_s28 }
  0x2a   : > { %p551_p3 = pnand %p549_p12, %p537_p2  ;;  %s555_s29 = scalar_lea.vmem %s554_s28, 256 }
  0x2b   : > { %p556_p7 = scmp.lt.s32.totalorder %s152_s23, %s554_s28  ;;  %p557_p6 = scmp.lt.s32.totalorder %s555_s29, %s548_s27 }
  0x2c   : > { %p552_p5 = pneg %p551_p3 }
  0x2d   : > { %p558_p4 = por %p557_p6, %p556_p7 }
  0x2f   : > { %p559_p10 = pnand %p558_p4, %p552_p5 }
  0x31   : > { %562 = shalt.err (!%p559_p10)
}
  0x32   : > { %442 = dma.hbm_to_vmem [thread:$0]  (!%p766_p11), %s149_s16, 128, %s152_s23, %s138_s18  }
  0x33   : > { %160 = sbr.rel (%p722_p8) target bundleno = 314 (0x13a), region = 28  ;;  %s777_s30 = sand.u32 (!%p722_p8), 1, %s631_s10  }
  0x34   : > { %s414_s4 = sshll.u32 (!%p722_p8), %s777_s30, 3  ;;  %s163_s6 = scalar_lea.sflag (!%p722_p8), [#allocation3], %s777_s30 }
  0x35   : > { %s166_s7 = scalar_lea.vmem (!%p722_p8), [#allocation2], %s414_s4  ;;  %p845_p9 = scmp.ne.s32.totalorder (!%p722_p8), %s839_s19, 0 }
  0x38   : > { %614 = dma.done.wait (%p845_p9), %s163_s6, 128  }
  0x39   : > { %616 = vsyncadd (%p845_p9), %s163_s6, 4294967168 }
  0x3a   : > { %618 = dma.done.wait (%p702_p1), [#allocation6], 64  }
  0x3b   : > { %620 = vsyncadd (%p702_p1), [#allocation6], 4294967232  ;;  %v651_v0 = vmov 0.0   ;;  %v193_v1 = vld [vmem:[%s166_s7] sm:$0xff]  ;;  %vm202_vm0 = vcmask 1043456   ;;  %vm198_vm1 = vcmask 31744  }
  0x3c   : > { %271 = vmatprep.mubr.f32.mxu0 %v651_v0  ;;  %v194_v2 = vmul.f32 %v193_v1, %v193_v1  ;;  %v195_v4 = vld [vmem:[#allocation5] sm:$0xf]  ;;  %s426_s17 = sshll.u32 %s639_s12, 7  ;;  %s190_s19 = scalar_lea.vmem [#allocation7], %s414_s4 }
  0x3d   : > { %s311_s21 = sshll.u32 %s190_s19, 4  ;;  %s309_s16 = scalar_lea.hbm %s835_s2, %s426_s17  ;;  %s312_s21 = int_to_ptr.vmem [resolvable:$true] %s311_s21 }
  0x3e   : > { %v197_v3 = vcombine.high %v194_v2, %v194_v2  ;;  %s295_s22 = scalar_lea.sflag [#allocation4], %s777_s30  ;;  %s563_s23 = scalar_lea.vmem %s312_s21, 128 }
  0x3f   : > { %p564_p1 = scmp.ne.s32.totalorder %s312_s21, %s563_s23  ;;  %s652_s24 = smov [#allocation7]  }
  0x40   : > { %417 = vmatprep.subr.msk.mxu0 %vm202_vm0, %v197_v3  ;;  %s567_s18 = sshll.u32 %s652_s24, 4  ;;  %s568_s18 = int_to_ptr.vmem [resolvable:$false] %s567_s18 }
  0x41   : > { %418 = vmatpush1.msk.msra.mxu0 %vm202_vm0, %v194_v2  ;;  %p565_p8 = pnand %p564_p1, %p754_p0  ;;  %s569_s12 = scalar_lea.vmem %s568_s18, 256 }
  0x42   : > { %419 = vmatmul.mubr.msk.f32.vlgmr.msra.gmra.mxu0 %vm198_vm1, %v195_v4  ;;  %p570_p11 = scmp.lt.s32.totalorder %s312_s21, %s568_s18  ;;  %p571_p2 = scmp.lt.s32.totalorder %s569_s12, %s563_s23 }
  0x43   : > { %p566_p13 = pneg %p565_p8 }
  0x44   : > { %p572_p12 = por %p571_p2, %p570_p11 }
  0x46   : > { %p573_p3 = pnand %p572_p12, %p566_p13 }
 0x102   : > { %v273_v5 = vpop.f32.mrf.mxu0 }
 0x103   : > { %v274_v6 = vadd.f32 1.0, %v273_v5 }
 0x104   : > { %v275_v7 = vpop.f32.mrf.mxu0 }
 0x105   : > { %501 = vlog2.f32 %v274_v6  ;;  %v276_v8 = vadd.f32 1.0, %v275_v7 }
 0x107   : > { %503 = vlog2.f32 %v276_v8 }
 0x112   : > { %v502_v9 = vpop.eup %501 }
 0x113   : > { %v279_v10 = vmul.f32 0.6931472, %v502_v9 }
 0x114   : > { %v504_v11 = vpop.eup %503 }
 0x115   : > { %v282_v12 = vmul.f32 -0.75, %v279_v10  ;;  %v281_v13 = vmul.f32 0.6931472, %v504_v11 }
 0x117   : > { %v284_v14 = vmul.f32 1.442695, %v282_v12  ;;  %v283_v15 = vmul.f32 -0.75, %v281_v13 }
 0x119   : > { %v286_v16 = vmul.f32 1.442695, %v283_v15  ;;  %505 = vpow2.f32 %v284_v14 }
 0x11b   : > { %507 = vpow2.f32 %v286_v16 }
 0x126   : > { %v506_v17 = vpop.eup %505 }
 0x128   : > { %v508_v18 = vpop.eup %507 }
 0x129   : > { %v290_v19 = vcombine.low %v506_v17, %v508_v18 }
 0x12b   : > { %v292_v20 = vmul.f32 %v290_v19, %v193_v1 }
 0x12d   : > { %293 = vst [vmem:[%s190_s19] sm:$0xff] %v292_v20 }
 0x12e   : > { %576 = shalt.err (!%p573_p3)
}
 0x12f   : > { %s577_s27 = scalar_lea.hbm %s309_s16, 128  ;;  %s581_s29 = scalar_lea.hbm %s835_s2, 256 }
 0x130   : > { %p578_p5 = scmp.ne.s32.totalorder %s309_s16, %s577_s27  ;;  %p582_p4 = scmp.lt.s32.totalorder %s309_s16, %s835_s2 }
 0x131   : > { %p583_p10 = scmp.lt.s32.totalorder %s581_s29, %s577_s27 }
 0x132   : > { %p579_p7 = pnand %p578_p5, %p754_p0 }
 0x133   : > { %p584_p9 = por %p583_p10, %p582_p4 }
 0x134   : > { %p580_p6 = pneg %p579_p7 }
 0x136   : > { %p585_p1 = pnand %p584_p9, %p580_p6 }
 0x138   : > { %588 = shalt.err (!%p585_p1)
}
 0x139   : > { %433 = dma.vmem_to_hbm [thread:$0]  (%p754_p0), %s312_s21, 128, %s309_s16, %s295_s22  }
 0x13a PF: > { %s323_s6 = sand.u32 1, %s627_s9   ;;  %p846_p8 = scmp.ne.s32.totalorder %s840_s20, 0 }
 0x13b   : > { %p847_p13 = scmp.ge.s32.totalorder %s647_s14, 2  ;;  %s324_s7 = scalar_lea.sflag [#allocation4], %s323_s6 }
 0x13d   : > { %p444_p11 = pnand %p847_p13, %p846_p8 }
 0x13f   : > { %p445_p2 = pneg %p444_p11 }
 0x141   : > { %622 = dma.done.wait (%p445_p2), %s324_s7, 128  }
 0x142   : > { %624 = vsyncadd (%p445_p2), %s324_s7, 4294967168  ;;  %s19_s14 = sadd.s32 1, %s647_s14   ;;  %s848_s9 = smov %s631_s10 }
 0x143   : > { %p16_p12 = scmp.ge.s32.totalorder %s19_s14, 4   ;;  %s849_s10 = smov %s635_s11 }
 0x144   : > { %s850_s11 = smov %s760_s5  ;;  %s851_s12 = smov %s643_s13 }
 0x145   : > { %s852_s13 = smov %s854_s25  ;;  %18 = sbr.rel (!%p16_p12) target bundleno = 7 (0x7), region = 77 }
 0x14a   :  { %329 = vsyncpa [#allocation3], 1 }
 0x14b   :  { %331 = vsyncpa [#allocation3 + $0x1], 1 }
 0x14c   :  { %332 = vsyncpa [#allocation6], 1 }
 0x14d   :  { %333 = vsyncpa [#allocation4], 1 }
 0x14e   :  { %335 = vsyncpa [#allocation4 + $0x1], 1 }

</bundles_post_ra>
